<compile_context>
chip_gen: v5e
topology: v5e:2x2
jax: 0.10.0
libtpu: 0.0.40
codegen_flags: <defaults>
</compile_context>

<pallas_src>
import functools

import jax
import jax.numpy as jnp
from jax.experimental import pallas as pl
from jax.experimental.pallas import tpu as pltpu


def _make_divisible(v, divisor, min_value=None):
    if min_value is None:
        min_value = divisor
    new_v = max(min_value, int(v + divisor / 2) // divisor * divisor)
    if new_v < 0.9 * v:
        new_v += divisor
    return new_v


def se_kernel(x_ref, w1_ref, b1_ref, w2_ref, b2_ref, o_ref, *, inv_hw):
    # x_ref : (Bt, C, HW)   current batch tile (true HW, no padding)
    # w1_ref: (C, Hid)   b1_ref: (1, Hid)
    # w2_ref: (Hid, C)   b2_ref: (1, C)
    x = x_ref[...]

    # --- squeeze: AdaptiveAvgPool2d(1) == mean over HW.  dtype=f32 widens the
    # accumulation per-vreg (no whole-tile f32 temporary for bf16 inputs).
    pooled = jnp.sum(x, axis=-1, dtype=jnp.float32) * inv_hw            # (Bt, C)

    # --- excite: Linear -> SiLU -> Linear -> Sigmoid, batched over Bt rows.
    h = jnp.dot(pooled, w1_ref[...], preferred_element_type=jnp.float32)
    h = h + b1_ref[...]
    h = h * jax.nn.sigmoid(h)                                           # SiLU
    g = jnp.dot(h, w2_ref[...], preferred_element_type=jnp.float32)
    g = jax.nn.sigmoid(g + b2_ref[...])                                 # (Bt, C)

    # --- scale: gate cast to the input dtype so the broadcast multiply does
    # not promote the whole tile to f32 when x is bf16.
    o_ref[...] = (x * g.astype(x.dtype)[:, :, None]).astype(o_ref.dtype)


def _vmem_plan():
    """Generation-aware VMEM capacity / budget / scoped-limit selection."""
    cap = 64 * 1024 * 1024  # conservative default (v7x-sized)
    try:
        info = pltpu.get_tpu_info()
        cap = int(getattr(info, "vmem_capacity_bytes", cap))
    except Exception:
        pass
    budget = min(cap // 2, 48 * 1024 * 1024)        # for pipelined in+out blocks
    limit = min(cap * 3 // 4, 100 * 1024 * 1024)    # raised scoped VMEM limit
    return cap, budget, limit


def _choose_batch_tile(B, per_batch_bytes, vmem_budget_bytes,
                       target_block_bytes=8 << 20, min_steps=4):
    """Pick the batch tile Bt (a divisor of B).

    Preference order (per the perf review):
      1. double-buffered in+out fits the VMEM budget,
      2. per-step input block <= ~8 MiB (blocks this size already saturate HBM),
      3. grid length >= min(B, 4)  (enough steps for pipelining + 2 TCs on v7x),
      4. even grid length (no idle TensorCore on the last wave on v7x),
      5. then the largest Bt satisfying the above (fewest grid steps).
    Returns (Bt, single_buffer_fallback).
    """
    divisors = [d for d in range(1, B + 1) if B % d == 0]
    fitting = [d for d in divisors if 4 * d * per_batch_bytes <= vmem_budget_bytes]
    if not fitting:
        # Even a single batch row does not fit double-buffered in+out
        # (possible on v7x's 64 MiB VMEM for large C*HW feature maps).
        return 1, True
    cands = [d for d in fitting if d * per_batch_bytes <= target_block_bytes] or fitting
    want_steps = min(B, min_steps)
    enough = [d for d in cands if B // d >= want_steps] or cands
    even = [d for d in enough if (B // d) % 2 == 0] or enough
    return max(even), False


def se_layer(x_nchw, w1, b1, w2, b2):
    B, C, H, W = x_nchw.shape
    HW = H * W
    hidden = w1.shape[1]
    itemsize = jnp.dtype(x_nchw.dtype).itemsize

    # Free reshape (collapses contiguous trailing dims); no padding, no
    # post-kernel slice -> exactly one HBM read and one HBM write of x.
    x = x_nchw.reshape(B, C, HW)

    cap, budget, vmem_limit = _vmem_plan()
    per_batch_bytes = C * HW * itemsize
    Bt, single_buffer = _choose_batch_tile(B, per_batch_bytes, budget)
    steps = B // Bt
    grid = (steps,)

    # Pipeline depth for the x input/output blocks (None -> default double buffer).
    x_in_mode = None
    x_out_mode = None
    if single_buffer:
        # v7x-sized VMEM fallback: drop x to single buffering and accept
        # exposed DMA instead of failing to compile / forcing spills.
        x_in_mode = pl.Buffered(1)
        x_out_mode = pl.Buffered(1)
        needed = 2 * per_batch_bytes + (4 << 20)
        if needed > cap:
            # TODO(synk): add an HW-tiled two-phase grid (accumulate the pool
            # over an "arbitrary" HW axis, then a second HW sweep applies the
            # gate) for feature maps whose single (1, C, HW) block exceeds
            # physical VMEM even single-buffered.
            pass
        vmem_limit = int(min(cap, max(vmem_limit, needed)))
    elif (cap >= (100 << 20) and steps >= 3
          and Bt * per_batch_bytes >= (512 << 10)
          and 5 * Bt * per_batch_bytes <= budget):
        # v5e/v6e (128 MiB VMEM): spend spare VMEM on a 3-deep input pipeline
        # so the DMA engine stays ahead of the per-step gate bubble.  Only
        # worth it when the block is big enough for DMA time to matter.
        x_in_mode = pl.Buffered(3)

    def x_spec(mode):
        if mode is None:
            return pl.BlockSpec((Bt, C, HW), lambda i: (i, 0, 0))
        return pl.BlockSpec((Bt, C, HW), lambda i: (i, 0, 0), pipeline_mode=mode)

    kernel = functools.partial(se_kernel, inv_hw=1.0 / float(HW))

    weight_bytes = sum(int(a.size) * jnp.dtype(a.dtype).itemsize
                       for a in (w1, b1, w2, b2))
    cost = pl.CostEstimate(
        flops=2 * B * C * HW + 4 * B * C * hidden,     # pool+scale + tiny FCs
        transcendentals=B * (hidden + C),
        bytes_accessed=2 * B * C * HW * itemsize + weight_bytes,
    )

    out = pl.pallas_call(
        kernel,
        out_shape=jax.ShapeDtypeStruct((B, C, HW), x.dtype),
        grid_spec=pltpu.PrefetchScalarGridSpec(
            num_scalar_prefetch=0,
            grid=grid,
            in_specs=[
                x_spec(x_in_mode),
                pl.BlockSpec((C, hidden), lambda i: (0, 0)),
                pl.BlockSpec((1, hidden), lambda i: (0, 0)),
                pl.BlockSpec((hidden, C), lambda i: (0, 0)),
                pl.BlockSpec((1, C), lambda i: (0, 0)),
            ],
            out_specs=x_spec(x_out_mode),
        ),
        compiler_params=pltpu.CompilerParams(
            dimension_semantics=("parallel",),
            vmem_limit_bytes=int(vmem_limit),
        ),
        cost_estimate=cost,
    )(x, w1, b1, w2, b2)

    return out.reshape(B, C, H, W)


def se_layer_ref(x_nchw, w1, b1, w2, b2):
    """Pure-JAX reference matching the PyTorch SELayer forward."""
    y = jnp.mean(x_nchw, axis=(2, 3))
    h = y @ w1 + b1[0]
    h = h * jax.nn.sigmoid(h)
    y = jax.nn.sigmoid(h @ w2 + b2[0])
    return x_nchw * y[:, :, None, None]


def _run_case(key, B, C, H, W, reduction=4):
    inp = oup = C
    hidden = _make_divisible(inp // reduction, 8)
    kx, k1, k2, k3, k4 = jax.random.split(key, 5)
    x = jax.random.normal(kx, (B, C, H, W), dtype=jnp.float32)
    # nn.Linear(oup, hidden) / nn.Linear(hidden, oup) weights stored as
    # (in, out) so `y @ W` matches PyTorch's `y @ W_t.T`.
    w1 = jax.random.normal(k1, (oup, hidden), dtype=jnp.float32) * 0.1
    b1 = jax.random.normal(k2, (1, hidden), dtype=jnp.float32) * 0.1
    w2 = jax.random.normal(k3, (hidden, oup), dtype=jnp.float32) * 0.1
    b2 = jax.random.normal(k4, (1, oup), dtype=jnp.float32) * 0.1

    out = jax.block_until_ready(se_layer(x, w1, b1, w2, b2))
    ref = se_layer_ref(x, w1, b1, w2, b2)
    assert out.shape == (B, C, H, W)
    assert jnp.allclose(out, ref, atol=1e-5, rtol=1e-5), \
        f"mismatch vs reference for shape {(B, C, H, W)}"


if __name__ == "__main__":
    key = jax.random.PRNGKey(0)
    k0, k1 = jax.random.split(key)
    # Primary config: lane-aligned spatial size (HW = 256), grid = (2,).
    _run_case(k0, B=2, C=32, H=16, W=16)
    # Secondary config: non-128-multiple spatial size (HW = 49), grid = (4,),
    # exercised with no host-side padding or post-kernel slicing.
    _run_case(k1, B=4, C=48, H=7, W=7)
    print("KERNEL_OK")
</pallas_src>

<mosaic_0001>
module attributes {stable_mosaic.version = 11 : i64} {
  func.func @se_kernel(%arg0: i32, %arg1: memref<1x32x256xf32, #tpu.memory_space<vmem>>, %arg2: memref<32x8xf32, #tpu.memory_space<vmem>>, %arg3: memref<1x8xf32, #tpu.memory_space<vmem>>, %arg4: memref<8x32xf32, #tpu.memory_space<vmem>>, %arg5: memref<1x32xf32, #tpu.memory_space<vmem>>, %arg6: memref<1x32x256xf32, #tpu.memory_space<vmem>>) attributes {dimension_semantics = [#tpu.dimension_semantics<parallel>], iteration_bounds = array<i64: 2>, scalar_prefetch = 0 : i64, scratch_operands = 0 : i64, tpu.core_type = #tpu.core_type<tc>, window_params = [{transform_indices = @transform_0, window_bounds = array<i64: 1, 32, 256>}, {pipeline_mode = #tpu.pipeline_mode<synchronous>, transform_indices = @transform_1, window_bounds = array<i64: 32, 8>}, {pipeline_mode = #tpu.pipeline_mode<synchronous>, transform_indices = @transform_2, window_bounds = array<i64: 1, 8>}, {pipeline_mode = #tpu.pipeline_mode<synchronous>, transform_indices = @transform_3, window_bounds = array<i64: 8, 32>}, {pipeline_mode = #tpu.pipeline_mode<synchronous>, transform_indices = @transform_4, window_bounds = array<i64: 1, 32>}, {transform_indices = @transform_5, window_bounds = array<i64: 1, 32, 256>}]} {
    %c0 = arith.constant 0 : index
    %c0_0 = arith.constant 0 : index
    %c0_1 = arith.constant 0 : index
    %0 = vector.load %arg1[%c0, %c0_0, %c0_1] : memref<1x32x256xf32, #tpu.memory_space<vmem>>, vector<1x32x256xf32>
    %cst = arith.constant dense<0.000000e+00> : vector<1x32xf32>
    %1 = vector.multi_reduction <add>, %0, %cst [2] : vector<1x32x256xf32> to vector<1x32xf32>
    %cst_2 = arith.constant 3.906250e-03 : f32
    %2 = vector.broadcast %cst_2 : f32 to vector<1x32xf32>
    %3 = arith.mulf %1, %2 : vector<1x32xf32>
    %c0_3 = arith.constant 0 : index
    %c0_4 = arith.constant 0 : index
    %4 = vector.load %arg2[%c0_3, %c0_4] : memref<32x8xf32, #tpu.memory_space<vmem>>, vector<32x8xf32>
    %cst_5 = arith.constant dense<0.000000e+00> : vector<1x8xf32>
    %5 = tpu.matmul %3, %4, %cst_5 {dimension_numbers = #tpu.dot_dimension_numbers<[1], [0], [0], [1], [0, 0, 1, 1], [], []>} : vector<1x32xf32>, vector<32x8xf32>, vector<1x8xf32> -> vector<1x8xf32>
    %c0_6 = arith.constant 0 : index
    %c0_7 = arith.constant 0 : index
    %6 = vector.load %arg3[%c0_6, %c0_7] : memref<1x8xf32, #tpu.memory_space<vmem>>, vector<1x8xf32>
    %7 = arith.addf %5, %6 : vector<1x8xf32>
    %8 = arith.negf %7 : vector<1x8xf32>
    %9 = math.exp %8 : vector<1x8xf32>
    %cst_8 = arith.constant 1.000000e+00 : f32
    %10 = vector.broadcast %cst_8 : f32 to vector<1x8xf32>
    %11 = arith.addf %10, %9 : vector<1x8xf32>
    %12 = arith.divf %10, %11 : vector<1x8xf32>
    %13 = arith.mulf %7, %12 : vector<1x8xf32>
    %c0_9 = arith.constant 0 : index
    %c0_10 = arith.constant 0 : index
    %14 = vector.load %arg4[%c0_9, %c0_10] : memref<8x32xf32, #tpu.memory_space<vmem>>, vector<8x32xf32>
    %cst_11 = arith.constant dense<0.000000e+00> : vector<1x32xf32>
    %15 = tpu.matmul %13, %14, %cst_11 {dimension_numbers = #tpu.dot_dimension_numbers<[1], [0], [0], [1], [0, 0, 1, 1], [], []>} : vector<1x8xf32>, vector<8x32xf32>, vector<1x32xf32> -> vector<1x32xf32>
    %c0_12 = arith.constant 0 : index
    %c0_13 = arith.constant 0 : index
    %16 = vector.load %arg5[%c0_12, %c0_13] : memref<1x32xf32, #tpu.memory_space<vmem>>, vector<1x32xf32>
    %17 = arith.addf %15, %16 : vector<1x32xf32>
    %18 = arith.negf %17 : vector<1x32xf32>
    %19 = math.exp %18 : vector<1x32xf32>
    %cst_14 = arith.constant 1.000000e+00 : f32
    %20 = vector.broadcast %cst_14 : f32 to vector<1x32xf32>
    %21 = arith.addf %20, %19 : vector<1x32xf32>
    %22 = arith.divf %20, %21 : vector<1x32xf32>
    %23 = vector.shape_cast %22 : vector<1x32xf32> to vector<1x32x1xf32>
    %24 = vector.broadcast %23 : vector<1x32x1xf32> to vector<1x32x256xf32>
    %25 = arith.mulf %0, %24 : vector<1x32x256xf32>
    %c0_15 = arith.constant 0 : index
    %c0_16 = arith.constant 0 : index
    %c0_17 = arith.constant 0 : index
    %26 = vector.load %arg6[%c0_15, %c0_16, %c0_17] : memref<1x32x256xf32, #tpu.memory_space<vmem>>, vector<1x32x256xf32>
    tpu.vector_store %arg6[%c0_15, %c0_16, %c0_17], %25 {strides = array<i32>} : memref<1x32x256xf32, #tpu.memory_space<vmem>>, vector<1x32x256xf32>,
    return
  }
  func.func @transform_0(%arg0: i32) -> (i32, i32, i32) {
    %c0_i32 = arith.constant 0 : i32
    %c0_i32_0 = arith.constant 0 : i32
    %c0_i32_1 = arith.constant 0 : i32
    return %arg0, %c0_i32, %c0_i32_0 : i32, i32, i32
  }
  func.func @transform_1(%arg0: i32) -> (i32, i32) {
    %c0_i32 = arith.constant 0 : i32
    %c0_i32_0 = arith.constant 0 : i32
    %c0_i32_1 = arith.constant 0 : i32
    return %c0_i32, %c0_i32_0 : i32, i32
  }
  func.func @transform_2(%arg0: i32) -> (i32, i32) {
    %c0_i32 = arith.constant 0 : i32
    %c0_i32_0 = arith.constant 0 : i32
    %c0_i32_1 = arith.constant 0 : i32
    return %c0_i32, %c0_i32_0 : i32, i32
  }
  func.func @transform_3(%arg0: i32) -> (i32, i32) {
    %c0_i32 = arith.constant 0 : i32
    %c0_i32_0 = arith.constant 0 : i32
    %c0_i32_1 = arith.constant 0 : i32
    return %c0_i32, %c0_i32_0 : i32, i32
  }
  func.func @transform_4(%arg0: i32) -> (i32, i32) {
    %c0_i32 = arith.constant 0 : i32
    %c0_i32_0 = arith.constant 0 : i32
    %c0_i32_1 = arith.constant 0 : i32
    return %c0_i32, %c0_i32_0 : i32, i32
  }
  func.func @transform_5(%arg0: i32) -> (i32, i32, i32) {
    %c0_i32 = arith.constant 0 : i32
    %c0_i32_0 = arith.constant 0 : i32
    %c0_i32_1 = arith.constant 0 : i32
    return %arg0, %c0_i32, %c0_i32_0 : i32, i32, i32
  }
}

</mosaic_0001>

<bundles_post_ra>
// kernel: tpu_custom_call.1
= control target key start
LH: loop header
LB: loop body
LE: loop exit
PB: predicated region body
PF: predicated region fallthrough
CT: control target
= control target key end

     0   :  { %10 = vsyncpa [#allocation3], 0  ;;  %s910_s0 = inlined_call_operand.hbm [shape: f32[2,32,256], index: 0, kind: input, shape index: {}]   ;;  %s911_s1 = inlined_call_operand.vmem [shape: f32[32,8], index: 1, kind: input, shape index: {}]   ;;  %s912_s2 = inlined_call_operand.vmem [shape: f32[1,8], index: 2, kind: input, shape index: {}]   ;;  %s913_s3 = inlined_call_operand.vmem [shape: f32[8,32], index: 3, kind: input, shape index: {}]   ;;  %s914_s4 = inlined_call_operand.vmem [shape: f32[1,32], index: 4, kind: input, shape index: {}]   ;;  %s915_s5 = inlined_call_operand.hbm [shape: f32[2,32,256], index: 5, kind: output, shape index: {}]  }
   0x1   :  { %12 = vsyncpa [#allocation3 + $0x1], 0 }
   0x2   :  { %13 = vsyncpa [#allocation4], 0 }
   0x3   :  { %15 = vsyncpa [#allocation4 + $0x1], 0  ;;  %s726_s18 = smov 0   ;;  %s728_s19 = smov 0  }
   0x4   :  { %s730_s20 = smov 0   ;;  %s732_s21 = smov 0  }
   0x5 LB: > { %s747_s22 = sadd.s32 4294967295, %s690_s21   ;;  %s511_s23 = sadd.s32 4294967294, %s690_s21   ;;  %s690_s21 = sphi %s732_s21, %s925_s21   ;;  %s686_s20 = sphi %s730_s20, %s924_s20   ;;  %s682_s19 = sphi %s728_s19, %s923_s19   ;;  %s678_s18 = sphi %s726_s18, %s922_s18  }
   0x6   : > { %s751_s24 = sadd.s32 1, %s690_s21   ;;  %s28_s25 = sadd.s32 1, %s686_s20 }
   0x7   : > { %s25_s26 = ssub.s32 %s690_s21, %s751_s24  ;;  %p35_p0 = scmp.ne.s32.totalorder %s686_s20, %s682_s19 }
   0x8   : > { %p26_p1 = scmp.eq.s32.totalorder %s25_s26, 0  ;;  %p36_p2 = scmp.eq.s32.totalorder %s690_s21, 0 }
   0x9   : > { %p41_p3 = scmp.ne.s32.totalorder %s682_s19, %s678_s18  ;;  %p42_p4 = scmp.eq.s32.totalorder %s747_s22, 0 }
   0xa   : > { %s763_s27 = scalar_select %p26_p1, %s686_s20, %s28_s25  }
   0xb   : > { %p765_p5 = por %p36_p2, %p35_p0  ;;  %p769_p6 = por %p42_p4, %p41_p3 }
   0xc   : > { %p149_p7 = scmp.eq.s32.totalorder %s747_s22, 1  ;;  %p155_p8 = scmp.eq.s32.totalorder %s511_s23, 1 }
   0xd   : > { %p543_p10 = scmp.lt.s32.totalorder %s690_s21, 2  ;;  %s187_s7 = sand.u32 1, %s686_s20  }
   0xe   : > { %p776_p11 = por %p149_p7, %p35_p0  ;;  %p780_p12 = por %p155_p8, %p41_p3 }
   0xf   : > { %s529_s8 = sshll.u32 %s690_s21, 6  ;;  %s514_s9 = sshll.u32 %s187_s7, 6 }
  0x10   : > { %s196_s12 = scalar_lea.hbm %s910_s0, %s529_s8  ;;  %s191_s14 = scalar_lea.vmem [#allocation2], %s514_s9 }
  0x11   : > { %s197_s13 = sshll.u32 %s196_s12, 4  ;;  %s199_s15 = sshll.u32 %s191_s14, 4  ;;  %s198_s13 = int_to_ptr.hbm [resolvable:$true] %s197_s13  ;;  %s200_s15 = int_to_ptr.vmem [resolvable:$true] %s199_s15 }
  0x12   : > { %p791_p13 = pnand %p543_p10, %p765_p5  ;;  %p517_p0 = scmp.ge.s32.totalorder %s690_s21, 1 }
  0x13   : > { %p207_p1 = scmp.lt.s32.totalorder %s690_s21, 3  ;;  %s188_s17 = scalar_lea.sflag [#allocation3], %s187_s7 }
  0x14   : > { %s594_s23 = sshra.s32 %s198_s13, 4  ;;  %p598_p3 = pneg %p791_p13  ;;  %s595_s23 = int_to_ptr.hbm [resolvable:$true] %s594_s23 }
  0x15   : > { %s596_s25 = scalar_lea.hbm %s595_s23, 64  ;;  %s601_s28 = scalar_lea.hbm %s910_s0, 128 }
  0x16   : > { %p597_p2 = scmp.ne.s32.totalorder %s595_s23, %s596_s25  ;;  %p602_p5 = scmp.lt.s32.totalorder %s595_s23, %s910_s0 }
  0x17   : > { %p603_p8 = scmp.lt.s32.totalorder %s601_s28, %s596_s25 }
  0x18   : > { %p599_p4 = pnand %p598_p3, %p597_p2 }
  0x19   : > { %p604_p10 = por %p603_p8, %p602_p5 }
  0x1a   : > { %p600_p7 = pneg %p599_p4 }
  0x1c   : > { %p605_p9 = pnand %p604_p10, %p600_p7 }
  0x1e   : > { %608 = shalt.err (!%p605_p9)
}
  0x1f   : > { %s692_s7 = smov 256   ;;  %s693_s11 = smov 16  }
  0x20   : > { %538 = dma.hbm_to_vmem [thread:$0]  (!%p791_p13), %s198_s13, 1024, %s200_s15, %s188_s17, %s692_s7, %s692_s7, %s693_s11  }
  0x21   : > { %p208_p2 = pnand %p517_p0, %p207_p1 }
  0x22   : > { %s812_s12 = sand.u32 (!%p208_p2), 1, %s682_s19  }
  0x23   : > { %211 = sbr.rel (%p208_p2) target bundleno = 615 (0x267), region = 40  ;;  %s518_s14 = sshll.u32 (!%p208_p2), %s812_s12, 6 }
  0x24   : > { %s214_s23 = scalar_lea.sflag (!%p208_p2), [#allocation3], %s812_s12  ;;  %s217_s25 = scalar_lea.vmem (!%p208_p2), [#allocation2], %s518_s14 }
  0x28   : > { %669 = dma.done.wait (%p769_p6), %s214_s23, 1024  }
  0x29   : > { %671 = vsyncadd (%p769_p6), %s214_s23, 4294966272  ;;  %v822_v0 = vld [vmem:[%s217_s25] sm:$0xff]  ;;  %v824_v1 = vld [vmem:[%s217_s25 + $0x8] sm:$0xff]  ;;  %v278_v16 = vlaneseq  ;;  %vm283_vm0 = vcmask 130112   ;;  %vm287_vm1 = vcmask 195712   ;;  %vm291_vm2 = vcmask 261312  }
  0x2a   : > { %v826_v2 = vld [vmem:[%s217_s25 + $0x20] sm:$0xff]  ;;  %v253_v3 = vadd.f32 %v824_v1, %v822_v0  ;;  %v830_v4 = vld [vmem:[%s217_s25 + $0x28] sm:$0xff]  ;;  %v834_v6 = vld [vmem:[%s217_s25 + $0x10] sm:$0xff]  ;;  %vm293_vm3 = vcmask 261120   ;;  %vm338_vm8 = vcmask 64512   ;;  %s244_s29 = scalar_lea.vmem [#allocation5], %s518_s14 }
  0x2b   : > { %v259_v5 = vadd.f32 %v830_v4, %v826_v2  ;;  %v836_v7 = vld [vmem:[%s217_s25 + $0x18] sm:$0xff]  ;;  %v838_v8 = vld [vmem:[%s217_s25 + $0x30] sm:$0xff]  ;;  %v270_v14 = vld [vmem:[%s911_s1 + $0x8] sm:$0xff]  ;;  %v279_v19 = vand.u32 127, %v278_v16  ;;  %v383_v54 = vshrl.u32 %v278_v16, 7  ;;  %s530_s13 = sshll.u32 %s747_s22, 6 }
  0x2c   : > { %254 = vadd.xlane.f32.xlu0 %v253_v3  ;;  %v840_v9 = vld [vmem:[%s217_s25 + $0x38] sm:$0xff]  ;;  %v256_v10 = vadd.f32 %v836_v7, %v834_v6  ;;  %v271_v13 = vld [vmem:[%s911_s1 + $0x10] sm:$0xff]  ;;  %v269_v15 = vld [vmem:[%s911_s1] sm:$0xff]  ;;  %s434_s17 = scalar_lea.hbm %s915_s5, %s530_s13  ;;  %s435_s26 = sshll.u32 %s244_s29, 4  ;;  %s436_s26 = int_to_ptr.vmem [resolvable:$true] %s435_s26 }
  0x2d   : > { %260 = vadd.xlane.f32.xlu1 %v259_v5  ;;  %v262_v11 = vadd.f32 %v840_v9, %v838_v8  ;;  %v272_v12 = vld [vmem:[%s911_s1 + $0x18] sm:$0xff]  ;;  %v281_v21 = vadd.s32 4294967288, %v279_v19  ;;  %v285_v22 = vadd.s32 4294967280, %v279_v19  ;;  %v289_v25 = vadd.s32 4294967272, %v279_v19  ;;  %v273_v36 = vld [vmem:[%s912_s2] sm:$0x1]  ;;  %581 = vset.pattern.permute.xlu2 %v383_v54 }
  0x2e   : > { %308 = vmatpush.msra.mxu0 %v272_v12  ;;  %v336_v37 = vld [vmem:[%s913_s3] sm:$0xff]  ;;  %v402_v55 = vadd.s32 24, %v383_v54  ;;  %v396_v56 = vadd.s32 16, %v383_v54  ;;  %s437_s8 = sshll.u32 %s434_s17, 4  ;;  %s423_s22 = scalar_lea.sflag [#allocation4], %s812_s12  ;;  %s438_s8 = int_to_ptr.hbm [resolvable:$true] %s437_s8 }
  0x2f   : > { %357 = vmatpush.msra.mxu1 %v336_v37  ;;  %v337_v57 = vld [vmem:[%s914_s4] sm:$0x1]  ;;  %s638_s14 = sshra.s32 %s438_s8, 4  ;;  %s644_s7 = scalar_lea.hbm %s915_s5, 128  ;;  %s639_s14 = int_to_ptr.hbm [resolvable:$true] %s638_s14 }
  0x30   : > { %309 = vmatpush.msra.mxu0 %v271_v13  ;;  %584 = vset.pattern.permute.xlu1 %v402_v55  ;;  %s640_s28 = scalar_lea.hbm %s639_s14, 64  ;;  %p645_p0 = scmp.lt.s32.totalorder %s639_s14, %s915_s5 }
  0x31   : > { %583 = vset.pattern.permute.xlu0 %v396_v56  ;;  %p641_p6 = scmp.ne.s32.totalorder %s639_s14, %s640_s28  ;;  %p646_p1 = scmp.lt.s32.totalorder %s644_s7, %s640_s28 }
  0x32   : > { %310 = vmatpush.msra.mxu0 %v270_v14 }
  0x33   : > { %p642_p9 = pnand %p641_p6, %p776_p11  ;;  %p647_p3 = por %p646_p1, %p645_p0 }
  0x34   : > { %257 = vadd.xlane.f32.xlu0 %v256_v10  ;;  %311 = vmatpush.msra.mxu0 %v269_v15 }
  0x35   : > { %263 = vadd.xlane.f32.xlu1 %v262_v11  ;;  %p643_p13 = pneg %p642_p9 }
  0x37   : > { %p648_p4 = pnand %p647_p3, %p643_p13 }
  0x9f   : > { %v255_v17 = vpop.xlane.xlu0 %254 }
  0xa0   : > { %v261_v18 = vpop.xlane.xlu1 %260  ;;  %v265_v20 = vmul.f32 0.00390625, %v255_v17 }
  0xa1   : > { %v267_v23 = vmul.f32 0.00390625, %v261_v18  ;;  %v390_v18 = vadd.s32 8, %v383_v54 }
  0xa2   : > { %v280_v29 = vperm.slane %v265_v20, %v279_v19 }
  0xa3   : > { %v286_v31 = vperm.slane %v267_v23, %v285_v22 }
  0xa7   : > { %v258_v24 = vpop.xlane.xlu0 %257 }
  0xa8   : > { %v266_v26 = vmul.f32 0.00390625, %v258_v24  ;;  %v264_v27 = vpop.xlane.xlu1 %263 }
  0xa9   : > { %v268_v28 = vmul.f32 0.00390625, %v264_v27 }
  0xaa   : > { %v282_v30 = vperm.slane %v266_v26, %v281_v21 }
  0xab   : > { %v290_v32 = vperm.slane %v268_v28, %v289_v25 }
  0xac   : > { %v284_v33 = vsel %vm283_vm0, %v282_v30, %v280_v29 }
  0xad   : > { %v288_v34 = vsel %vm287_vm1, %v286_v31, %v284_v33 }
  0xae   : > { %v292_v35 = vsel %vm291_vm2, %v290_v32, %v288_v34 }
  0xaf   : > { %520 = vmatmul.msk.f32.vlgmr.msra.gmra.mxu0 %vm293_vm3, %v292_v35 }
 0x12c   : > { %v313_v38 = vpop.f32.mrf.mxu0 }
 0x12d   : > { %v314_v39 = vadd.f32 %v313_v38, %v273_v36 }
 0x12f   : > { %v521_v40 = vmul.f32 -1.442695, %v314_v39 }
 0x131   : > { %586 = vpow2.f32 %v521_v40 }
 0x137   : > { %v587_v41 = vpop.eup %586 }
 0x138   : > { %v319_v42 = vadd.f32 1.0, %v587_v41 }
 0x13a   : > { %588 = vrcp.f32 %v319_v42  ;;  %v331_v46 = vand.u32 2147483648, %v319_v42  ;;  %v329_v48 = vand.u32 2147483647, %v319_v42  ;;  %vm325_vm5 = vweird.f32 %v319_v42 }
 0x13c   : > { %v332_v50 = vor.u32 1.1754944e-38, %v331_v46  ;;  %vm330_vm7 = vcmp.eq.f32.partialorder %v329_v48, 8.507059e+37 }
 0x140   : > { %v589_v43 = vpop.eup %588 }
 0x141   : > { %v321_v44 = vmul.f32 %v589_v43, %v319_v42  ;;  %vm326_vm4 = vweird.f32 %v589_v43 }
 0x142   : > { %vm327_vm6 = vmor %vm325_vm5, %vm326_vm4 }
 0x143   : > { %v322_v45 = vsub.f32 1.0, %v321_v44 }
 0x145   : > { %v323_v47 = vmul.f32 %v589_v43, %v322_v45 }
 0x147   : > { %v324_v49 = vadd.f32 %v589_v43, %v323_v47 }
 0x149   : > { %v328_v51 = vsel %vm327_vm6, %v589_v43, %v324_v49 }
 0x14a   : > { %v333_v52 = vsel %vm330_vm7, %v332_v50, %v328_v51 }
 0x14b   : > { %v335_v53 = vmul.f32 %v333_v52, %v314_v39 }
 0x14d   : > { %522 = vmatmul.msk.f32.vlgmr.msra.gmra.mxu1 %vm338_vm8, %v335_v53 }
 0x1ca   : > { %v359_v58 = vpop.f32.mrf.mxu1 }
 0x1cb   : > { %v360_v59 = vadd.f32 %v359_v58, %v337_v57 }
 0x1cd   : > { %v523_v60 = vmul.f32 -1.442695, %v360_v59 }
 0x1cf   : > { %590 = vpow2.f32 %v523_v60 }
 0x1d5   : > { %v591_v61 = vpop.eup %590 }
 0x1d6   : > { %v365_v62 = vadd.f32 1.0, %v591_v61 }
 0x1d8   : > { %592 = vrcp.f32 %v365_v62  ;;  %v377_v10 = vand.u32 2147483648, %v365_v62  ;;  %v375_v12 = vand.u32 2147483647, %v365_v62  ;;  %vm371_vm10 = vweird.f32 %v365_v62 }
 0x1da   : > { %v378_v14 = vor.u32 1.1754944e-38, %v377_v10  ;;  %vm376_vm12 = vcmp.eq.f32.partialorder %v375_v12, 8.507059e+37 }
 0x1de   : > { %v593_v63 = vpop.eup %592 }
 0x1df   : > { %v367_v3 = vmul.f32 %v593_v63, %v365_v62  ;;  %vm372_vm9 = vweird.f32 %v593_v63 }
 0x1e0   : > { %vm373_vm11 = vmor %vm371_vm10, %vm372_vm9 }
 0x1e1   : > { %v368_v5 = vsub.f32 1.0, %v367_v3 }
 0x1e3   : > { %v369_v11 = vmul.f32 %v593_v63, %v368_v5 }
 0x1e5   : > { %v370_v13 = vadd.f32 %v593_v63, %v369_v11 }
 0x1e7   : > { %v374_v15 = vsel %vm373_vm11, %v593_v63, %v370_v13 }
 0x1e8   : > { %v379_v16 = vsel %vm376_vm12, %v378_v14, %v374_v15 }
 0x1e9   : > { %v381_v17 = vperm.slane %v379_v16, 0 }
 0x1eb   : > { %404 = vperm.xlu1 %584, %v381_v17   ;;  %398 = vperm.xlu0 %583, %v381_v17  }
 0x1ec   : > { %386 = vperm.xlu2 %581, %v381_v17  }
 0x1f3   : > { %585 = vset.pattern.permute.xlu0 %v402_v55 }
 0x1f4   : > { %582 = vset.pattern.permute.xlu2 %v390_v18 }
 0x1fc   : > { %392 = vperm.xlu2 %582, %v381_v17  }
 0x246   : > { %v387_v19 = vpop.permute.xlu2 %386 }
 0x247   : > { %v406_v20 = vmul.f32 %v387_v19, %v822_v0  ;;  %v407_v21 = vmul.f32 %v387_v19, %v824_v1 }
 0x249   : > { %414 = vst [vmem:[%s244_s29] sm:$0xff] %v406_v20 }
 0x24a   : > { %415 = vst [vmem:[%s244_s29 + $0x8] sm:$0xff] %v407_v21 }
 0x256   : > { %v393_v22 = vpop.permute.xlu2 %392 }
 0x257   : > { %v408_v23 = vmul.f32 %v393_v22, %v834_v6  ;;  %v409_v24 = vmul.f32 %v393_v22, %v836_v7 }
 0x259   : > { %416 = vst [vmem:[%s244_s29 + $0x10] sm:$0xff] %v408_v23 }
 0x25a   : > { %417 = vst [vmem:[%s244_s29 + $0x18] sm:$0xff] %v409_v24 }
 0x25d   : > { %v405_v0 = vpop.permute.xlu1 %404  ;;  %v399_v1 = vpop.permute.xlu0 %398 }
 0x25e   : > { %v412_v25 = vmul.f32 %v405_v0, %v838_v8  ;;  %v413_v26 = vmul.f32 %v405_v0, %v840_v9  ;;  %v410_v6 = vmul.f32 %v399_v1, %v826_v2  ;;  %v411_v7 = vmul.f32 %v399_v1, %v830_v4 }
 0x260   : > { %420 = vst [vmem:[%s244_s29 + $0x30] sm:$0xff] %v412_v25 }
 0x261   : > { %421 = vst [vmem:[%s244_s29 + $0x38] sm:$0xff] %v413_v26 }
 0x262   : > { %418 = vst [vmem:[%s244_s29 + $0x20] sm:$0xff] %v410_v6 }
 0x263   : > { %419 = vst [vmem:[%s244_s29 + $0x28] sm:$0xff] %v411_v7 }
 0x264   : > { %651 = shalt.err (!%p648_p4)
}
 0x265   : > { %s694_s12 = smov 256   ;;  %s695_s25 = smov 16  }
 0x266   : > { %533 = dma.vmem_to_hbm [thread:$0]  (%p776_p11), %s436_s26, 1024, %s438_s8, %s423_s22, %s694_s12, %s694_s12, %s695_s25  }
 0x267 PF: > { %s452_s29 = sand.u32 1, %s678_s18   ;;  %p921_p7 = scmp.ge.s32.totalorder %s690_s21, 2 }
 0x268   : > { %s453_s13 = scalar_lea.sflag [#allocation4], %s452_s29 }
 0x269   : > { %p540_p5 = pnand %p921_p7, %p780_p12 }
 0x26b   : > { %p541_p8 = pneg %p540_p5 }
 0x26d   : > { %673 = dma.done.wait (%p541_p8), %s453_s13, 1024  }
 0x26e   : > { %675 = vsyncadd (%p541_p8), %s453_s13, 4294966272  ;;  %p18_p10 = scmp.ge.s32.totalorder %s751_s24, 4   ;;  %s922_s18 = smov %s682_s19 }
 0x26f   : > { %s923_s19 = smov %s686_s20  ;;  %s924_s20 = smov %s763_s27 }
 0x270   : > { %s925_s21 = smov %s751_s24  ;;  %20 = sbr.rel (!%p18_p10) target bundleno = 5 (0x5), region = 85 }
 0x275   :  { %459 = vsyncpa [#allocation3], 1 }
 0x276   :  { %461 = vsyncpa [#allocation3 + $0x1], 1 }
 0x277   :  { %462 = vsyncpa [#allocation4], 1 }
 0x278   :  { %464 = vsyncpa [#allocation4 + $0x1], 1 }

</bundles_post_ra>
